<compile_context>
chip_gen: v6e
topology: v6e:2x2x1
jax: 0.10.0
libtpu: 0.0.40
codegen_flags: <defaults>
</compile_context>

<pallas_src>
import functools
import math

import jax
import jax.numpy as jnp
from jax.experimental import pallas as pl
from jax.experimental.pallas import tpu as pltpu


def _round_up(x, m):
    return (x + m - 1) // m * m


def _conv_kernel(win_ref, w_ref, b_ref, o_ref, *, ksize, stride, tho, wo):
    """One (batch item, output-row tile) step of the strided conv.

    win_ref: (stride*stride, tho+kq, Wph, Cin_p)  haloed phase window
    w_ref  : (K*K*Cin_p, Cout_p)                  flattened weights
    b_ref  : (1, Cout_p)                          bias (f32, zero-padded)
    o_ref  : (tho*wo, Cout_p)                     flattened output tile
    """
    cinp = win_ref.shape[-1]

    # In-VMEM im2col: K*K statically-shifted slices concatenated along the
    # minor dim -> ONE MXU matmul with a tall (K*K*Cin_p) contraction.
    pieces = []
    for kh in range(ksize):
        khq, khr = kh // stride, kh % stride
        for kw in range(ksize):
            kwq, kwr = kw // stride, kw % stride
            pieces.append(win_ref[khr * stride + kwr,
                                  khq:khq + tho,
                                  kwq:kwq + wo, :])            # (tho, wo, Cin_p)
    lhs = jnp.concatenate(pieces, axis=-1)                     # (tho, wo, K*K*Cin_p)
    lhs = lhs.reshape(tho * wo, ksize * ksize * cinp)          # single reshape

    acc = jnp.dot(lhs, w_ref[...], preferred_element_type=jnp.float32)
    acc = acc + b_ref[...].astype(jnp.float32)                 # bias once per tile
    o_ref[...] = acc.astype(o_ref.dtype)


def stride_conv(x_nchw, weight, bias=None, *, stride, tile_ho=None,
                compute_dtype=jnp.bfloat16, out_dtype=None):
    """StrideConv.forward: Conv2d(k, stride, padding=(k-1)//2, dilation=1, groups=1)."""
    cout, cin, kh_, kw_ = weight.shape
    assert kh_ == kw_, "square kernels only"
    ksize = kh_
    pad = (ksize - 1) // 2

    n, c, h, w = x_nchw.shape
    assert c == cin

    if bias is None:
        bias = jnp.zeros((cout,), jnp.float32)
    if out_dtype is None:
        out_dtype = x_nchw.dtype

    ho = (h + 2 * pad - ksize) // stride + 1
    wo = (w + 2 * pad - ksize) // stride + 1
    kq = (ksize - 1) // stride                 # row/col halo in phase space

    # ---- padded channel sizes ------------------------------------------------
    cinp = _round_up(cin, 8)                   # sublane-friendly contraction dim
    coutp = _round_up(cout, 128)               # lane-dense output stores
    kkc = ksize * ksize * cinp

    # ---- output-row (M) tiling: target ~1024 output rows per tile and make
    # tho*wo a multiple of 8 so the flattened output store is sublane-dense.
    if tile_ho is None:
        tile_ho = max(1, min(ho, max(1, 1024 // max(wo, 1))))
    factor = 8 // math.gcd(wo, 8)
    tho = _round_up(int(tile_ho), factor)
    n_mt = pl.cdiv(ho, tho)
    ho_pad = n_mt * tho
    thw = tho + kq                             # haloed window height

    # ---- pad + phase-decimate + window the input (NHWC, compute_dtype) -------
    hph = max(ho_pad + kq, -(-(h + 2 * pad) // stride))
    wph = max(wo + kq, -(-(w + 2 * pad) // stride))

    x = jnp.transpose(x_nchw, (0, 2, 3, 1)).astype(compute_dtype)   # NHWC
    xp = jnp.pad(x, ((0, 0),
                     (pad, hph * stride - h - pad),
                     (pad, wph * stride - w - pad),
                     (0, cinp - cin)))
    phases = xp.reshape(n, hph, stride, wph, stride, cinp)
    phases = jnp.transpose(phases, (0, 2, 4, 1, 3, 5))
    phases = phases.reshape(n, stride * stride, hph, wph, cinp)
    # Per-tile haloed windows: bounds VMEM per grid step (fits v7x's 64 MiB at
    # realistic image sizes), costs only a (tho+kq)/tho row duplication in HBM.
    windows = jnp.stack(
        [phases[:, :, m * tho: m * tho + thw] for m in range(n_mt)], axis=1)
    # windows: (n, n_mt, stride*stride, thw, wph, cinp)

    # weight: (Cout,Cin,K,K) -> (K*K*Cin_p, Cout_p); padded rows/cols are zero.
    w_r = jnp.pad(weight, ((0, coutp - cout), (0, cinp - cin), (0, 0), (0, 0)))
    w_r = jnp.transpose(w_r, (2, 3, 1, 0)).reshape(kkc, coutp).astype(compute_dtype)
    b_r = jnp.pad(bias.astype(jnp.float32), (0, coutp - cout)).reshape(1, coutp)

    kernel = functools.partial(_conv_kernel, ksize=ksize, stride=stride,
                               tho=tho, wo=wo)

    # ---- VMEM budget / scheduler cost hint ------------------------------------
    c_item = jnp.dtype(compute_dtype).itemsize
    o_item = jnp.dtype(out_dtype).itemsize
    win_block = stride * stride * thw * wph * cinp * c_item
    out_block = tho * wo * coutp * o_item
    w_bytes = kkc * coutp * c_item + coutp * 4
    lhs_bytes = tho * wo * kkc * c_item
    acc_bytes = tho * wo * coutp * 4
    vmem_limit = int(min(96 * 2 ** 20,
                         max(32 * 2 ** 20,
                             2 * win_block + 2 * out_block + 2 * w_bytes
                             + 2 * lhs_bytes + 2 * acc_bytes + (4 << 20))))

    cost = pl.CostEstimate(
        flops=2 * n * ho_pad * wo * kkc * coutp,
        transcendentals=0,
        bytes_accessed=int(windows.size * c_item + w_r.size * c_item
                           + n * ho_pad * wo * coutp * o_item),
    )

    out = pl.pallas_call(
        kernel,
        out_shape=jax.ShapeDtypeStruct((n, ho_pad * wo, coutp), out_dtype),
        grid_spec=pltpu.PrefetchScalarGridSpec(
            num_scalar_prefetch=0,
            grid=(n, n_mt),
            in_specs=[
                # Haloed per-tile window: block index changes every grid step,
                # so input DMA pipelines against compute and VMEM stays bounded.
                pl.BlockSpec((None, None, stride * stride, thw, wph, cinp),
                             lambda b, m: (b, m, 0, 0, 0, 0)),
                # Weights / bias: constant block index -> DMA'd once, reused.
                pl.BlockSpec((kkc, coutp), lambda b, m: (0, 0)),
                pl.BlockSpec((1, coutp), lambda b, m: (0, 0)),
            ],
            out_specs=pl.BlockSpec((None, tho * wo, coutp),
                                   lambda b, m: (b, m, 0)),
        ),
        compiler_params=pltpu.CompilerParams(
            dimension_semantics=("parallel", "parallel"),
            vmem_limit_bytes=vmem_limit),
        cost_estimate=cost,
    )(windows, w_r, b_r)

    out = out.reshape(n, ho_pad, wo, coutp)[:, :ho, :, :cout]   # strip padding
    return jnp.transpose(out, (0, 3, 1, 2))                     # NHWC -> NCHW


if __name__ == "__main__":
    key = jax.random.PRNGKey(0)
    k_x, k_w, k_b = jax.random.split(key, 3)

    # StrideConv(in_channels=4, out_channels=8, kernel_size=3, stride=2, bias=True)
    N, Cin, H, W = 2, 4, 16, 16
    Cout, K, stride = 8, 3, 2

    x = jax.random.normal(k_x, (N, Cin, H, W), dtype=jnp.float32)

    # Deterministic parameter init (PyTorch-style uniform(-1/sqrt(fan_in), ...)).
    fan_in = Cin * K * K
    bound = 1.0 / (fan_in ** 0.5)
    weight = jax.random.uniform(k_w, (Cout, Cin, K, K), jnp.float32, -bound, bound)
    bias = jax.random.uniform(k_b, (Cout,), jnp.float32, -bound, bound)

    out = jax.block_until_ready(stride_conv(x, weight, bias, stride=stride))

    # Correctness check: kernel runs the matmul in bf16 with f32 accumulation,
    # so compare against XLA's conv applied to bf16-rounded operands.
    x_ref = x.astype(jnp.bfloat16).astype(jnp.float32)
    w_ref = weight.astype(jnp.bfloat16).astype(jnp.float32)
    ref = jax.lax.conv_general_dilated(
        x_ref, w_ref, window_strides=(stride, stride),
        padding=[((K - 1) // 2, (K - 1) // 2)] * 2,
        dimension_numbers=("NCHW", "OIHW", "NCHW"),
    ) + bias.reshape(1, Cout, 1, 1)

    assert out.shape == (N, Cout, H // stride, W // stride)
    assert jnp.allclose(out, ref, atol=5e-3, rtol=5e-3), \
        float(jnp.max(jnp.abs(out - ref)))

    print("KERNEL_OK")
</pallas_src>

<mosaic_0001>
module attributes {stable_mosaic.version = 11 : i64} {
  func.func @_conv_kernel(%arg0: i32, %arg1: i32, %arg2: memref<1x1x4x9x9x8xbf16, #tpu.memory_space<vmem>>, %arg3: memref<72x128xbf16, #tpu.memory_space<vmem>>, %arg4: memref<1x128xf32, #tpu.memory_space<vmem>>, %arg5: memref<1x64x128xf32, #tpu.memory_space<vmem>>) attributes {dimension_semantics = [#tpu.dimension_semantics<parallel>, #tpu.dimension_semantics<parallel>], iteration_bounds = array<i64: 2, 1>, scalar_prefetch = 0 : i64, scratch_operands = 0 : i64, tpu.core_type = #tpu.core_type<tc>, window_params = [{transform_indices = @transform_0, window_bounds = array<i64: 1, 1, 4, 9, 9, 8>}, {pipeline_mode = #tpu.pipeline_mode<synchronous>, transform_indices = @transform_1, window_bounds = array<i64: 72, 128>}, {pipeline_mode = #tpu.pipeline_mode<synchronous>, transform_indices = @transform_2, window_bounds = array<i64: 1, 128>}, {transform_indices = @transform_3, window_bounds = array<i64: 1, 64, 128>}]} {
    %c0 = arith.constant 0 : index
    %c0_0 = arith.constant 0 : index
    %c0_1 = arith.constant 0 : index
    %c0_2 = arith.constant 0 : index
    %c0_3 = arith.constant 0 : index
    %c0_4 = arith.constant 0 : index
    %0 = vector.load %arg2[%c0, %c0_0, %c0_1, %c0_2, %c0_3, %c0_4] : memref<1x1x4x9x9x8xbf16, #tpu.memory_space<vmem>>, vector<1x1x1x8x8x8xbf16>
    %1 = vector.shape_cast %0 : vector<1x1x1x8x8x8xbf16> to vector<8x8x8xbf16>
    %c0_5 = arith.constant 0 : index
    %c0_6 = arith.constant 0 : index
    %c1 = arith.constant 1 : index
    %c0_7 = arith.constant 0 : index
    %c0_8 = arith.constant 0 : index
    %c0_9 = arith.constant 0 : index
    %2 = vector.load %arg2[%c0_5, %c0_6, %c1, %c0_7, %c0_8, %c0_9] : memref<1x1x4x9x9x8xbf16, #tpu.memory_space<vmem>>, vector<1x1x1x8x8x8xbf16>
    %3 = vector.shape_cast %2 : vector<1x1x1x8x8x8xbf16> to vector<8x8x8xbf16>
    %c0_10 = arith.constant 0 : index
    %c0_11 = arith.constant 0 : index
    %c0_12 = arith.constant 0 : index
    %c0_13 = arith.constant 0 : index
    %c1_14 = arith.constant 1 : index
    %c0_15 = arith.constant 0 : index
    %4 = vector.load %arg2[%c0_10, %c0_11, %c0_12, %c0_13, %c1_14, %c0_15] : memref<1x1x4x9x9x8xbf16, #tpu.memory_space<vmem>>, vector<1x1x1x8x8x8xbf16>
    %5 = vector.shape_cast %4 : vector<1x1x1x8x8x8xbf16> to vector<8x8x8xbf16>
    %c0_16 = arith.constant 0 : index
    %c0_17 = arith.constant 0 : index
    %c2 = arith.constant 2 : index
    %c0_18 = arith.constant 0 : index
    %c0_19 = arith.constant 0 : index
    %c0_20 = arith.constant 0 : index
    %6 = vector.load %arg2[%c0_16, %c0_17, %c2, %c0_18, %c0_19, %c0_20] : memref<1x1x4x9x9x8xbf16, #tpu.memory_space<vmem>>, vector<1x1x1x8x8x8xbf16>
    %7 = vector.shape_cast %6 : vector<1x1x1x8x8x8xbf16> to vector<8x8x8xbf16>
    %c0_21 = arith.constant 0 : index
    %c0_22 = arith.constant 0 : index
    %c3 = arith.constant 3 : index
    %c0_23 = arith.constant 0 : index
    %c0_24 = arith.constant 0 : index
    %c0_25 = arith.constant 0 : index
    %8 = vector.load %arg2[%c0_21, %c0_22, %c3, %c0_23, %c0_24, %c0_25] : memref<1x1x4x9x9x8xbf16, #tpu.memory_space<vmem>>, vector<1x1x1x8x8x8xbf16>
    %9 = vector.shape_cast %8 : vector<1x1x1x8x8x8xbf16> to vector<8x8x8xbf16>
    %c0_26 = arith.constant 0 : index
    %c0_27 = arith.constant 0 : index
    %c2_28 = arith.constant 2 : index
    %c0_29 = arith.constant 0 : index
    %c1_30 = arith.constant 1 : index
    %c0_31 = arith.constant 0 : index
    %10 = vector.load %arg2[%c0_26, %c0_27, %c2_28, %c0_29, %c1_30, %c0_31] : memref<1x1x4x9x9x8xbf16, #tpu.memory_space<vmem>>, vector<1x1x1x8x8x8xbf16>
    %11 = vector.shape_cast %10 : vector<1x1x1x8x8x8xbf16> to vector<8x8x8xbf16>
    %c0_32 = arith.constant 0 : index
    %c0_33 = arith.constant 0 : index
    %c0_34 = arith.constant 0 : index
    %c1_35 = arith.constant 1 : index
    %c0_36 = arith.constant 0 : index
    %c0_37 = arith.constant 0 : index
    %12 = vector.load %arg2[%c0_32, %c0_33, %c0_34, %c1_35, %c0_36, %c0_37] : memref<1x1x4x9x9x8xbf16, #tpu.memory_space<vmem>>, vector<1x1x1x8x8x8xbf16>
    %13 = vector.shape_cast %12 : vector<1x1x1x8x8x8xbf16> to vector<8x8x8xbf16>
    %c0_38 = arith.constant 0 : index
    %c0_39 = arith.constant 0 : index
    %c1_40 = arith.constant 1 : index
    %c1_41 = arith.constant 1 : index
    %c0_42 = arith.constant 0 : index
    %c0_43 = arith.constant 0 : index
    %14 = vector.load %arg2[%c0_38, %c0_39, %c1_40, %c1_41, %c0_42, %c0_43] : memref<1x1x4x9x9x8xbf16, #tpu.memory_space<vmem>>, vector<1x1x1x8x8x8xbf16>
    %15 = vector.shape_cast %14 : vector<1x1x1x8x8x8xbf16> to vector<8x8x8xbf16>
    %c0_44 = arith.constant 0 : index
    %c0_45 = arith.constant 0 : index
    %c0_46 = arith.constant 0 : index
    %c1_47 = arith.constant 1 : index
    %c1_48 = arith.constant 1 : index
    %c0_49 = arith.constant 0 : index
    %16 = vector.load %arg2[%c0_44, %c0_45, %c0_46, %c1_47, %c1_48, %c0_49] : memref<1x1x4x9x9x8xbf16, #tpu.memory_space<vmem>>, vector<1x1x1x8x8x8xbf16>
    %17 = vector.shape_cast %16 : vector<1x1x1x8x8x8xbf16> to vector<8x8x8xbf16>
    %18 = tpu.concatenate %1, %3, %5, %7, %9, %11, %13, %15, %17 in 2 : vector<8x8x8xbf16>, vector<8x8x8xbf16>, vector<8x8x8xbf16>, vector<8x8x8xbf16>, vector<8x8x8xbf16>, vector<8x8x8xbf16>, vector<8x8x8xbf16>, vector<8x8x8xbf16>, vector<8x8x8xbf16> -> vector<8x8x72xbf16>
    %19 = vector.shape_cast %18 : vector<8x8x72xbf16> to vector<64x72xbf16>
    %c0_50 = arith.constant 0 : index
    %c0_51 = arith.constant 0 : index
    %20 = vector.load %arg3[%c0_50, %c0_51] : memref<72x128xbf16, #tpu.memory_space<vmem>>, vector<72x128xbf16>
    %cst = arith.constant dense<0.000000e+00> : vector<64x128xf32>
    %21 = tpu.matmul %19, %20, %cst {dimension_numbers = #tpu.dot_dimension_numbers<[1], [0], [0], [1], [0, 0, 1, 1], [], []>} : vector<64x72xbf16>, vector<72x128xbf16>, vector<64x128xf32> -> vector<64x128xf32>
    %c0_52 = arith.constant 0 : index
    %c0_53 = arith.constant 0 : index
    %22 = vector.load %arg4[%c0_52, %c0_53] : memref<1x128xf32, #tpu.memory_space<vmem>>, vector<1x128xf32>
    %23 = vector.broadcast %22 : vector<1x128xf32> to vector<64x128xf32>
    %24 = arith.addf %21, %23 : vector<64x128xf32>
    %c0_54 = arith.constant 0 : index
    %c0_55 = arith.constant 0 : index
    %c0_56 = arith.constant 0 : index
    %25 = vector.load %arg5[%c0_54, %c0_55, %c0_56] : memref<1x64x128xf32, #tpu.memory_space<vmem>>, vector<1x64x128xf32>
    %26 = vector.shape_cast %25 : vector<1x64x128xf32> to vector<64x128xf32>
    %27 = vector.shape_cast %24 : vector<64x128xf32> to vector<1x64x128xf32>
    tpu.vector_store %arg5[%c0_54, %c0_55, %c0_56], %27 {strides = array<i32>} : memref<1x64x128xf32, #tpu.memory_space<vmem>>, vector<1x64x128xf32>,
    return
  }
  func.func @transform_0(%arg0: i32, %arg1: i32) -> (i32, i32, i32, i32, i32, i32) {
    %c0_i32 = arith.constant 0 : i32
    %c0_i32_0 = arith.constant 0 : i32
    %c0_i32_1 = arith.constant 0 : i32
    %c0_i32_2 = arith.constant 0 : i32
    %c0_i32_3 = arith.constant 0 : i32
    return %arg0, %arg1, %c0_i32, %c0_i32_0, %c0_i32_1, %c0_i32_2 : i32, i32, i32, i32, i32, i32
  }
  func.func @transform_1(%arg0: i32, %arg1: i32) -> (i32, i32) {
    %c0_i32 = arith.constant 0 : i32
    %c0_i32_0 = arith.constant 0 : i32
    %c0_i32_1 = arith.constant 0 : i32
    return %c0_i32, %c0_i32_0 : i32, i32
  }
  func.func @transform_2(%arg0: i32, %arg1: i32) -> (i32, i32) {
    %c0_i32 = arith.constant 0 : i32
    %c0_i32_0 = arith.constant 0 : i32
    %c0_i32_1 = arith.constant 0 : i32
    return %c0_i32, %c0_i32_0 : i32, i32
  }
  func.func @transform_3(%arg0: i32, %arg1: i32) -> (i32, i32, i32) {
    %c0_i32 = arith.constant 0 : i32
    %c0_i32_0 = arith.constant 0 : i32
    return %arg0, %arg1, %c0_i32 : i32, i32, i32
  }
}

</mosaic_0001>

<bundles_post_ra>
// kernel: tpu_custom_call.1
= control target key start
LH: loop header
LB: loop body
LE: loop exit
PB: predicated region body
PF: predicated region fallthrough
CT: control target
= control target key end

     0   :  { %8 = vsyncpa [#allocation3], 0  ;;  %s1977_s0 = inlined_call_operand.vmem [shape: bf16[2,1,4,9,9,8], index: 0, kind: input, shape index: {}]   ;;  %s1978_s1 = inlined_call_operand.vmem [shape: bf16[72,128], index: 1, kind: input, shape index: {}]   ;;  %s1979_s2 = inlined_call_operand.vmem [shape: f32[1,128], index: 2, kind: input, shape index: {}]   ;;  %s1980_s3 = inlined_call_operand.hbm [shape: f32[2,64,128], index: 3, kind: output, shape index: {}]  }
   0x1   :  { %10 = vsyncpa [#allocation3 + $0x1], 0  ;;  %s1603_s12 = smov 0   ;;  %s1605_s13 = smov 0  }
   0x2   :  { %s1607_s14 = smov 0   ;;  %s1609_s15 = smov 0  }
   0x3   :  { %s1611_s16 = smov 0   ;;  %s1613_s17 = smov 0  }
   0x4 LB: > { %s1175_s18 = sadd.s32 4294967295, %s1571_s17   ;;  %s1176_s19 = sadd.s32 4294967294, %s1571_s17   ;;  %s1571_s17 = sphi %s1613_s17, %s16_s17   ;;  %s1567_s16 = sphi %s1611_s16, %s1987_s16   ;;  %s1563_s15 = sphi %s1609_s15, %s1986_s15   ;;  %s1559_s14 = sphi %s1607_s14, %s1985_s14   ;;  %s1555_s13 = sphi %s1605_s13, %s1984_s13   ;;  %s1551_s12 = sphi %s1603_s12, %s1983_s12  }
   0x5   : > { %s28_s20 = sadd.s32 1, %s1567_s16  ;;  %s107_s21 = sadd.s32 1, %s1559_s14 }
   0x6   : > { %p30_p0 = scmp.ge.s32.totalorder %s28_s20, 2  ;;  %p117_p1 = scmp.ne.s32.totalorder %s1559_s14, %s1555_s13 }
   0x7   : > { %p118_p2 = scmp.eq.s32.totalorder %s1175_s18, 1  ;;  %p123_p3 = scmp.ne.s32.totalorder %s1555_s13, %s1551_s12 }
   0x8   : > { %s1989_s20 = smov (%p30_p0, %s28_s20), 0  ;;  %p124_p5 = scmp.eq.s32.totalorder %s1176_s19, 1 }
   0x9   : > { %p1643_p4 = por %p118_p2, %p117_p1  ;;  %s102_s23 = ssub.s32 %s1567_s16, %s1989_s20 }
   0xa   : > { %p1179_p6 = scmp.ge.s32.totalorder %s1571_s17, 1  ;;  %p105_p7 = scmp.eq.s32.totalorder %s102_s23, 0 }
   0xb   : > { %p1650_p8 = por %p124_p5, %p123_p3  ;;  %p160_p9 = scmp.lt.s32.totalorder %s1571_s17, 3 }
   0xc   : > { %s1656_s25 = scalar_select %p105_p7, %s1559_s14, %s107_s21  }
   0xd   : > { %p161_p10 = pnand %p1179_p6, %p160_p9 }
   0xe   : > { %p188_p11 = scmp.lt.s32.totalorder (!%p161_p10), %s1563_s15, 1  ;;  %s1573_s4 = smov (!%p161_p10), 8  }
   0xf   : > { %164 = sbr.rel (%p161_p10) target bundleno = 484 (0x1e4), region = 32  ;;  %s1574_s5 = smov (!%p161_p10), 16  }
  0x10   : > { %s1575_s6 = smov (!%p161_p10), 24   ;;  %s1576_s7 = smov (!%p161_p10), 32  }
  0x11   : > { %s1577_s8 = smov (!%p161_p10), 40   ;;  %s1578_s9 = smov (!%p161_p10), 48  }
  0x12   : > { %s1579_s21 = smov (!%p161_p10), 56   ;;  %s1321_s11 = sshll.u32 (!%p161_p10), %s1563_s15, 10 }
  0x13   : > { %s1925_s23 = scalar_lea.hbm (!%p161_p10), %s1980_s3, %s1321_s11 }
  0x14   : > { %s189_s26 = scalar_select %p188_p11, %s1563_s15, 1  ;;  %vm1000_vm0 = vcmask 1043456   ;;  %vm780_vm1 = vcmask 64512   ;;  %vm805_vm2 = vcmask 130048   ;;  %vm822_vm3 = vcmask 195584  }
  0x15   : > { %vm839_vm4 = vcmask 261120   ;;  %vm856_vm5 = vcmask 326656   ;;  %vm873_vm6 = vcmask 392192   ;;  %vm890_vm7 = vcmask 457728  }
  0x16   : > { %s1361_s27 = smul.u32 288, %s189_s26  ;;  %vm907_vm8 = vcmask 523264   ;;  %vm987_vm9 = vcmask 588800  }
  0x18   : > { %s1663_s30 = scalar_lea.vmem %s1977_s0, %s1361_s27  ;;  %s1581_s27 = smov [#allocation2]  }
  0x19   : > { %v1426_v0 = vld [vmem:[%s1663_s30 + $0x68] ss:$0 sps:$4 sm:$0xff]   ;;  %v1428_v2 = vld [vmem:[%s1663_s30 + $0x70] ss:$0 sps:$4 sm:$0xff]   ;;  %v1430_v4 = vld [vmem:[%s1663_s30 + $0x60] ss:$0 sps:$4 sm:$0xff]  }
  0x1a   : > { %v1427_v1 = vld [vmem:[%s1663_s30 + $0x48] ss:$0 sps:$4 sm:$0xff]   ;;  %308 = vrot.lane.b32.xlu1 %v1426_v0, %s1573_s4  ;;  %v1429_v3 = vld [vmem:[%s1663_s30 + $0x50] ss:$0 sps:$4 sm:$0xff]   ;;  %v1431_v5 = vld [vmem:[%s1663_s30 + $0x58] ss:$0 sps:$4 sm:$0xff]  }
  0x1b   : > { %300 = vrot.lane.b32.xlu0 %v1427_v1, %s1573_s4  ;;  %v1674_v6 = vld [vmem:[%s1663_s30 + $0x8] sm:$0xf]  ;;  %v217_v7 = vld [vmem:[%s1663_s30 + $0xc] sm:$0x1]  ;;  %v1680_v9 = vld [vmem:[%s1663_s30] sm:$0xf] }
  0x1c   : > { %v1247_v8 = vcombine.low %v1674_v6, %v217_v7  ;;  %v216_v10 = vld [vmem:[%s1663_s30 + $0x4] sm:$0x1]  ;;  %v1684_v11 = vld [vmem:[%s1663_s30 + $0x28] sm:$0xf]  ;;  %v221_v13 = vld [vmem:[%s1663_s30 + $0x2c] sm:$0x1] }
  0x1d   : > { %v1246_v12 = vcombine.low %v1680_v9, %v216_v10  ;;  %v1690_v14 = vld [vmem:[%s1663_s30 + $0x20] sm:$0xf]  ;;  %v220_v15 = vld [vmem:[%s1663_s30 + $0x24] sm:$0x1]  ;;  %v1251_v18 = vcombine.low %v1684_v11, %v221_v13  ;;  %v1697_v20 = vld [vmem:[%s1663_s30 + $0x18] sm:$0xf] }
  0x1e   : > { %310 = vrot.lane.b32.xlu1 %v1428_v2, %s1573_s4  ;;  %v1432_v16 = vld [vmem:[%s1663_s30 + $0x80] ss:$0 sps:$4 sm:$0xff]   ;;  %v366_v17 = vshll.u32 %v1247_v8, 16  ;;  %v1250_v19 = vcombine.low %v1690_v14, %v220_v15  ;;  %v219_v21 = vld [vmem:[%s1663_s30 + $0x1c] sm:$0x1]  ;;  %v364_v22 = vshrl.u32 %v1247_v8, 16 }
  0x1f   : > { %302 = vrot.lane.b32.xlu0 %v1429_v3, %s1573_s4  ;;  %v359_v23 = vshll.u32 %v1246_v12, 16  ;;  %v1701_v24 = vld [vmem:[%s1663_s30 + $0x10] sm:$0xf]  ;;  %v218_v25 = vld [vmem:[%s1663_s30 + $0x14] sm:$0x1]  ;;  %v357_v28 = vshrl.u32 %v1246_v12, 16  ;;  %v1249_v30 = vcombine.low %v1697_v20, %v219_v21 }
  0x20   : > { %v1433_v26 = vld [vmem:[%s1663_s30 + $0x78] ss:$0 sps:$4 sm:$0xff]   ;;  %v368_v27 = vrot.slane %v366_v17, 1  ;;  %v394_v29 = vshll.u32 %v1251_v18, 16  ;;  %v387_v32 = vshll.u32 %v1250_v19, 16  ;;  %v1248_v35 = vcombine.low %v1701_v24, %v218_v25  ;;  %s1499_s28 = sshll.u32 %s1581_s27, 4  ;;  %s1500_s28 = int_to_ptr.vmem [resolvable:$false] %s1499_s28 }
  0x21   : > { %v361_v31 = vrot.slane %v359_v23, 1  ;;  %v1709_v33 = vld [vmem:[%s1663_s30 + $0x38] sm:$0xf]  ;;  %v223_v34 = vld [vmem:[%s1663_s30 + $0x3c] sm:$0x1]  ;;  %v392_v38 = vshrl.u32 %v1251_v18, 16 }
  0x22   : > { %306 = vrot.lane.b32.xlu1 %v1430_v4, %s1573_s4  ;;  %v1714_v36 = vld [vmem:[%s1663_s30 + $0x30] sm:$0xf]  ;;  %v222_v37 = vld [vmem:[%s1663_s30 + $0x34] sm:$0x1]  ;;  %v385_v39 = vshrl.u32 %v1250_v19, 16  ;;  %v369_v40 = vor.u32 %v368_v27, %v364_v22  ;;  %v396_v41 = vrot.slane %v394_v29, 1  ;;  %v1253_v43 = vcombine.low %v1709_v33, %v223_v34 }
  0x23   : > { %304 = vrot.lane.b32.xlu0 %v1431_v5, %s1573_s4  ;;  %v380_v42 = vshll.u32 %v1249_v30, 16  ;;  %v362_v44 = vor.u32 %v361_v31, %v357_v28  ;;  %v389_v45 = vrot.slane %v387_v32, 1  ;;  %v373_v46 = vshll.u32 %v1248_v35, 16  ;;  %v1191_v0 = vld [vmem:[%s1663_s30 + $0x98] sm:$0xf]  ;;  %s1501_s29 = scalar_lea.vmem %s1500_s28, 2048 }
  0x24   : > { %v1252_v47 = vcombine.low %v1714_v36, %v222_v37  ;;  %v397_v48 = vor.u32 %v396_v41, %v392_v38  ;;  %v378_v49 = vshrl.u32 %v1249_v30, 16  ;;  %v408_v51 = vshll.u32 %v1253_v43, 16  ;;  %v1190_v1 = vld [vmem:[%s1663_s30 + $0x90] sm:$0xf]  ;;  %v1195_v4 = vld [vmem:[%s1663_s30 + $0xb8] sm:$0xf] }
  0x25   : > { %v382_v50 = vrot.slane %v380_v42, 1  ;;  %v390_v52 = vor.u32 %v389_v45, %v385_v39  ;;  %v371_v53 = vshrl.u32 %v1248_v35, 16  ;;  %v375_v54 = vrot.slane %v373_v46, 1  ;;  %v1194_v5 = vld [vmem:[%s1663_s30 + $0xb0] sm:$0xf] }
  0x26   : > { %314 = vrot.lane.b32.xlu1 %v1432_v16, %s1573_s4  ;;  %v401_v55 = vshll.u32 %v1252_v47, 16  ;;  %v406_v57 = vshrl.u32 %v1253_v43, 16  ;;  %v410_v58 = vrot.slane %v408_v51, 1  ;;  %v399_v60 = vshrl.u32 %v1252_v47, 16  ;;  %v1193_v10 = vld [vmem:[%s1663_s30 + $0xa8] sm:$0xf] }
  0x27   : > { %312 = vrot.lane.b32.xlu0 %v1433_v26, %s1573_s4  ;;  %v383_v56 = vor.u32 %v382_v50, %v378_v49  ;;  %v376_v59 = vor.u32 %v375_v54, %v371_v53  ;;  %v1255_v2 = vcombine.low %v1191_v0, %v1191_v0  ;;  %v1254_v3 = vcombine.low %v1190_v1, %v1190_v1  ;;  %v1192_v12 = vld [vmem:[%s1663_s30 + $0xa0] sm:$0xf]  ;;  %v1197_v16 = vld [vmem:[%s1663_s30 + $0xc8] sm:$0xf]  ;;  %v1207_v22 = vld [vmem:[%s1663_s30 + $0x9c] sm:$0x1] }
  0x28   : > { %v403_v61 = vrot.slane %v401_v55, 1  ;;  %v411_v62 = vor.u32 %v410_v58, %v406_v57  ;;  %v1259_v7 = vcombine.low %v1195_v4, %v1195_v4  ;;  %v1258_v8 = vcombine.low %v1194_v5, %v1194_v5  ;;  %v1196_v17 = vld [vmem:[%s1663_s30 + $0xc0] sm:$0xf]  ;;  %v1459_v23 = vld [vmem:[%s1663_s30 + $0xd8] ss:$0 sps:$4 sm:$0xff]  }
  0x29   : > { %v1257_v13 = vcombine.low %v1193_v10, %v1193_v10  ;;  %v1256_v15 = vcombine.low %v1192_v12, %v1192_v12  ;;  %v1261_v18 = vcombine.low %v1197_v16, %v1197_v16  ;;  %v1260_v19 = vcombine.low %v1196_v17, %v1196_v17  ;;  %v1458_v21 = vld [vmem:[%s1663_s30 + $0xe0] ss:$0 sps:$4 sm:$0xff]   ;;  %v1206_v25 = vld [vmem:[%s1663_s30 + $0x94] sm:$0x1]  ;;  %v1211_v29 = vld [vmem:[%s1663_s30 + $0xbc] sm:$0x1] }
  0x2a   : > { %414 = vrot.lane.b32.xlu1 %v369_v40, %s1574_s5  ;;  %v404_v63 = vor.u32 %v403_v61, %v399_v60  ;;  %v1271_v26 = vcombine.low %v1191_v0, %v1207_v22  ;;  %v1460_v27 = vld [vmem:[%s1663_s30 + $0x100] ss:$0 sps:$4 sm:$0xff]   ;;  %v1270_v28 = vcombine.low %v1190_v1, %v1206_v25  ;;  %v1461_v30 = vld [vmem:[%s1663_s30 + $0xf8] ss:$0 sps:$4 sm:$0xff]   ;;  %v1210_v31 = vld [vmem:[%s1663_s30 + $0xb4] sm:$0x1]  ;;  %v1275_v32 = vcombine.low %v1195_v4, %v1211_v29 }
  0x2b   : > { %412 = vrot.lane.b32.xlu0 %v362_v44, %s1574_s5  ;;  %v1462_v34 = vld [vmem:[%s1663_s30 + $0xf0] ss:$0 sps:$4 sm:$0xff]   ;;  %v1274_v37 = vcombine.low %v1194_v5, %v1210_v31  ;;  %v1209_v38 = vld [vmem:[%s1663_s30 + $0xac] sm:$0x1]  ;;  %v1463_v39 = vld [vmem:[%s1663_s30 + $0xe8] ss:$0 sps:$4 sm:$0xff]  }
  0x2c   : > { %v542_v35 = vshll.u32 %v1271_v26, 16  ;;  %v535_v40 = vshll.u32 %v1270_v28, 16  ;;  %v1208_v41 = vld [vmem:[%s1663_s30 + $0xa4] sm:$0x1]  ;;  %v1213_v42 = vld [vmem:[%s1663_s30 + $0xcc] sm:$0x1]  ;;  %v1273_v44 = vcombine.low %v1193_v10, %v1209_v38 }
  0x2d   : > { %v1212_v43 = vld [vmem:[%s1663_s30 + $0xc4] sm:$0x1]  ;;  %v1464_v45 = vld [vmem:[%s1663_s30 + $0x110] ss:$0 sps:$4 sm:$0xff]   ;;  %v540_v46 = vshrl.u32 %v1271_v26, 16  ;;  %v1272_v49 = vcombine.low %v1192_v12, %v1208_v41  ;;  %v533_v51 = vshrl.u32 %v1270_v28, 16  ;;  %v1277_v54 = vcombine.low %v1197_v16, %v1213_v42 }
  0x2e   : > { %422 = vrot.lane.b32.xlu1 %v397_v48, %s1574_s5  ;;  %v544_v47 = vrot.slane %v542_v35, 1  ;;  %v570_v48 = vshll.u32 %v1275_v32, 16  ;;  %v1465_v50 = vld [vmem:[%s1663_s30 + $0x108] ss:$0 sps:$4 sm:$0xff]   ;;  %v563_v53 = vshll.u32 %v1274_v37, 16  ;;  %v1276_v55 = vcombine.low %v1196_v17, %v1212_v43  ;;  %v1491_v43 = vld [vmem:[%s1978_s1 + $0x18] sm:$0xff]  }
  0x2f   : > { %420 = vrot.lane.b32.xlu0 %v390_v52, %s1574_s5  ;;  %v537_v52 = vrot.slane %v535_v40, 1  ;;  %v568_v57 = vshrl.u32 %v1275_v32, 16  ;;  %v561_v61 = vshrl.u32 %v1274_v37, 16  ;;  %v554_v1 = vshrl.u32 %v1273_v44, 16  ;;  %v1214_v22 = vld [vmem:[%s1663_s30 + $0x8] sm:$0xf] }
  0x30   : > { %v572_v58 = vrot.slane %v570_v48, 1  ;;  %v547_v5 = vshrl.u32 %v1272_v49, 16  ;;  %v582_v12 = vshrl.u32 %v1277_v54, 16  ;;  %v575_v16 = vshrl.u32 %v1276_v55, 16  ;;  %v1219_v26 = vld [vmem:[%s1663_s30 + $0x30] sm:$0xf] }
  0x31   : > { %v538_v60 = vor.u32 %v537_v52, %v533_v51  ;;  %v1278_v25 = vcombine.low %v1214_v22, %v1214_v22  ;;  %v1283_v28 = vcombine.low %v1219_v26, %v1219_v26  ;;  %v1759_v31 = vld [vmem:[%s1663_s30 + $0x18] sm:$0xf]  ;;  %v1764_v35 = vld [vmem:[%s1663_s30 + $0x40] sm:$0xf]  ;;  %v1235_v51 = vld [vmem:[%s1663_s30 + $0x34] sm:$0x1] }
  0x32   : > { %418 = vrot.lane.b32.xlu1 %v383_v56, %s1574_s5  ;;  %v545_v56 = vor.u32 %v544_v47, %v540_v46  ;;  %v573_v0 = vor.u32 %v572_v58, %v568_v57  ;;  %v1767_v37 = vld [vmem:[%s1663_s30 + $0x38] sm:$0xf]  ;;  %v1285_v38 = vcombine.low %v1764_v35, %v1764_v35  ;;  %v1230_v46 = vld [vmem:[%s1663_s30 + $0xc] sm:$0x1]  ;;  %v1485_v52 = vld [vmem:[%s1663_s30 + $0x70] ss:$0 sps:$4 sm:$0xff]  }
  0x33   : > { %416 = vrot.lane.b32.xlu0 %v376_v59, %s1574_s5  ;;  %v556_v59 = vshll.u32 %v1273_v44, 16  ;;  %v1284_v40 = vcombine.low %v1767_v37, %v1767_v37  ;;  %v1482_v42 = vld [vmem:[%s1663_s30 + $0x58] ss:$0 sps:$4 sm:$0xff]   ;;  %v1231_v44 = vld [vmem:[%s1663_s30 + $0x14] sm:$0x1]  ;;  %v1493_v57 = vld [vmem:[%s1978_s1 + $0x8] sm:$0xff]  }
  0x34   : > { %v1484_v48 = vld [vmem:[%s1663_s30 + $0x78] ss:$0 sps:$4 sm:$0xff]  }
  0x36   : > { %426 = vrot.lane.b32.xlu1 %v411_v62, %s1574_s5  ;;  %v565_v62 = vrot.slane %v563_v53, 1  ;;  %v1234_v53 = vld [vmem:[%s1663_s30 + $0x2c] sm:$0x1] }
  0x37   : > { %424 = vrot.lane.b32.xlu0 %v404_v63, %s1574_s5  ;;  %v549_v63 = vshll.u32 %v1272_v49, 16  ;;  %v1492_v49 = vld [vmem:[%s1978_s1 + $0x10] sm:$0xff]  }
  0x38   : > { %v566_v4 = vor.u32 %v565_v62, %v561_v61  ;;  %v1232_v62 = vld [vmem:[%s1663_s30 + $0x1c] sm:$0x1] }
  0x3a   : > { %454 = vrot.lane.b32.xlu1 %v1255_v2, %s1575_s6  ;;  %v558_v2 = vrot.slane %v556_v59, 1  ;;  %v1233_v59 = vld [vmem:[%s1663_s30 + $0x24] sm:$0x1] }
  0x3b   : > { %452 = vrot.lane.b32.xlu0 %v1254_v3, %s1575_s6  ;;  %v584_v3 = vshll.u32 %v1277_v54, 16  ;;  %v1299_v54 = vcombine.low %v1219_v26, %v1235_v51 }
  0x3c   : > { %v559_v10 = vor.u32 %v558_v2, %v554_v1  ;;  %v1488_v2 = vld [vmem:[%s1663_s30 + $0x88] ss:$0 sps:$4 sm:$0xff]  }
  0x3e   : > { %462 = vrot.lane.b32.xlu1 %v1259_v7, %s1575_s6  ;;  %v551_v7 = vrot.slane %v549_v63, 1  ;;  %v1237_v63 = vld [vmem:[%s1663_s30 + $0x44] sm:$0x1] }
  0x3f   : > { %460 = vrot.lane.b32.xlu0 %v1258_v8, %s1575_s6  ;;  %v577_v8 = vshll.u32 %v1276_v55, 16  ;;  %v1486_v55 = vld [vmem:[%s1663_s30 + $0x68] ss:$0 sps:$4 sm:$0xff]  }
  0x41   : > { %v579_v17 = vrot.slane %v577_v8, 1  ;;  %v1296_v8 = vcombine.low %v1759_v31, %v1232_v62 }
  0x42   : > { %458 = vrot.lane.b32.xlu1 %v1257_v13, %s1575_s6  ;;  %v586_v13 = vrot.slane %v584_v3, 1 }
  0x43   : > { %456 = vrot.lane.b32.xlu0 %v1256_v15, %s1575_s6  ;;  %v552_v15 = vor.u32 %v551_v7, %v547_v5  ;;  %v746_v5 = vshll.u32 %v1299_v54, 16  ;;  %v1494_v7 = vld [vmem:[%s1978_s1] sm:$0xff]  }
  0x46   : > { %466 = vrot.lane.b32.xlu1 %v1261_v18, %s1575_s6  ;;  %v587_v18 = vor.u32 %v586_v13, %v582_v12 }
  0x47   : > { %464 = vrot.lane.b32.xlu0 %v1260_v19, %s1575_s6  ;;  %v580_v19 = vor.u32 %v579_v17, %v575_v16  ;;  %v1301_v16 = vcombine.low %v1764_v35, %v1237_v63  ;;  %s185_s6 = sand.u32 1, %s1555_s13  }
  0x48   : > { %s1931_s15 = scalar_lea.sflag [#allocation3], %s185_s6 }
  0x4a   : > { %494 = vrot.lane.b32.xlu1 %v1458_v21, %s1576_s7  ;;  %v1215_v21 = vld [vmem:[%s1663_s30 + $0x10] sm:$0xf] }
  0x4b   : > { %492 = vrot.lane.b32.xlu0 %v1459_v23, %s1576_s7  ;;  %v1279_v23 = vcombine.low %v1215_v21, %v1215_v21  ;;  %v1295_v47 = vcombine.low %v1215_v21, %v1231_v44  ;;  %v748_v21 = vrot.slane %v746_v5, 1 }
  0x4d   : > { %v716_v3 = vshrl.u32 %v1295_v47, 16 }
  0x4e   : > { %502 = vrot.lane.b32.xlu1 %v1460_v27, %s1576_s7  ;;  %v1218_v27 = vld [vmem:[%s1663_s30 + $0x28] sm:$0xf] }
  0x4f   : > { %500 = vrot.lane.b32.xlu0 %v1461_v30, %s1576_s7  ;;  %v1282_v29 = vcombine.low %v1218_v27, %v1218_v27  ;;  %v1217_v30 = vld [vmem:[%s1663_s30 + $0x20] sm:$0xf]  ;;  %v1298_v58 = vcombine.low %v1218_v27, %v1234_v53  ;;  %v725_v27 = vshll.u32 %v1296_v8, 16 }
  0x50   : > { %v1281_v32 = vcombine.low %v1217_v30, %v1217_v30  ;;  %v1297_v1 = vcombine.low %v1217_v30, %v1233_v59 }
  0x51   : > { %v727_v35 = vrot.slane %v725_v27, 1 }
  0x52   : > { %498 = vrot.lane.b32.xlu1 %v1462_v34, %s1576_s7  ;;  %v1280_v34 = vcombine.low %v1759_v31, %v1759_v31  ;;  %v760_v31 = vshll.u32 %v1301_v16, 16 }
  0x53   : > { %496 = vrot.lane.b32.xlu0 %v1463_v39, %s1576_s7  ;;  %v1490_v39 = vld [vmem:[%s1978_s1 + $0x20] ss:$0 sps:$4 sm:$0xff]  }
  0x54   : > { %1359 = vmatprep.subr.msk.bf16.mxu0 %vm1000_vm0, %v1490_v39  ;;  %1360 = vmatprep.subr.msk.bf16.mxu1 %vm1000_vm0, %v1490_v39  ;;  %v1002_v41 = vsel %vm1000_vm0, %v1490_v39, 0 }
  0x55   : > { %1332 = vmatpush3.bf16.msra.mxu0 %v1002_v41  ;;  %1354 = vmatpush3.bf16.msra.mxu1 %v1002_v41  ;;  %v758_v41 = vshrl.u32 %v1301_v16, 16 }
  0x56   : > { %506 = vrot.lane.b32.xlu1 %v1464_v45, %s1576_s7  ;;  %v1483_v45 = vld [vmem:[%s1663_s30 + $0x50] ss:$0 sps:$4 sm:$0xff]   ;;  %1333 = vmatprep.subr.bf16.mxu0 %v1491_v43 }
  0x57   : > { %504 = vrot.lane.b32.xlu0 %v1465_v50, %s1576_s7  ;;  %1350 = vmatprep.subr.bf16.mxu1 %v1491_v43  ;;  %v1294_v50 = vcombine.low %v1214_v22, %v1230_v46  ;;  %v732_v22 = vshll.u32 %v1297_v1, 16  ;;  %s1180_s7 = sshll.u32 %s185_s6, 6 }
  0x58   : > { %s187_s10 = scalar_lea.vmem [#allocation2], %s1180_s7 }
  0x59   : > { %1334 = vmatpush3.bf16.msra.mxu0 %v1491_v43  ;;  %1355 = vmatpush3.bf16.msra.mxu1 %v1491_v43  ;;  %v711_v61 = vshll.u32 %v1294_v50, 16  ;;  %v709_v12 = vshrl.u32 %v1294_v50, 16  ;;  %v734_v30 = vrot.slane %v732_v22, 1  ;;  %s1093_s18 = sshll.u32 %s187_s10, 4  ;;  %s1927_s18 = int_to_ptr.vmem [resolvable:$true] %s1093_s18 }
  0x5a   : > { %590 = vrot.lane.b32.xlu1 %v545_v56, %s1577_s8  ;;  %1335 = vmatprep.subr.bf16.mxu0 %v1492_v49  ;;  %v718_v56 = vshll.u32 %v1295_v47, 16  ;;  %s1495_s26 = scalar_lea.vmem %s1927_s18, 1024  ;;  %p1502_p1 = scmp.lt.s32.totalorder %s1927_s18, %s1500_s28 }
  0x5b   : > { %588 = vrot.lane.b32.xlu0 %v538_v60, %s1577_s8  ;;  %1351 = vmatprep.subr.bf16.mxu1 %v1492_v49  ;;  %v1487_v60 = vld [vmem:[%s1663_s30 + $0x60] ss:$0 sps:$4 sm:$0xff]   ;;  %v713_v13 = vrot.slane %v711_v61, 1  ;;  %p1496_p12 = scmp.ne.s32.totalorder %s1927_s18, %s1495_s26  ;;  %p1503_p2 = scmp.lt.s32.totalorder %s1501_s29, %s1495_s26 }
  0x5d   : > { %1336 = vmatpush3.bf16.msra.mxu0 %v1492_v49  ;;  %1356 = vmatpush3.bf16.msra.mxu1 %v1492_v49  ;;  %p1497_p13 = pnand %p1496_p12, %p1643_p4  ;;  %p1504_p3 = por %p1503_p2, %p1502_p1 }
  0x5e   : > { %598 = vrot.lane.b32.xlu1 %v573_v0, %s1577_s8  ;;  %1337 = vmatprep.subr.bf16.mxu0 %v1493_v57  ;;  %v1236_v0 = vld [vmem:[%s1663_s30 + $0x3c] sm:$0x1] }
  0x5f   : > { %596 = vrot.lane.b32.xlu0 %v566_v4, %s1577_s8  ;;  %1352 = vmatprep.subr.bf16.mxu1 %v1493_v57  ;;  %v720_v4 = vrot.slane %v718_v56, 1  ;;  %v1300_v17 = vcombine.low %v1767_v37, %v1236_v0  ;;  %p1498_p0 = pneg %p1497_p13 }
  0x61   : > { %1338 = vmatpush3.bf16.msra.mxu0 %v1493_v57  ;;  %1357 = vmatpush3.bf16.msra.mxu1 %v1493_v57  ;;  %v753_v37 = vshll.u32 %v1300_v17, 16  ;;  %v751_v44 = vshrl.u32 %v1300_v17, 16  ;;  %p1505_p5 = pnand %p1504_p3, %p1498_p0 }
  0x62   : > { %594 = vrot.lane.b32.xlu1 %v559_v10, %s1577_s8  ;;  %v1489_v10 = vld [vmem:[%s1663_s30 + $0x80] ss:$0 sps:$4 sm:$0xff]   ;;  %1339 = vmatprep.subr.bf16.mxu0 %v1494_v7  ;;  %s1580_s30 = smov 64  }
  0x63   : > { %592 = vrot.lane.b32.xlu0 %v552_v15, %s1577_s8  ;;  %v739_v15 = vshll.u32 %v1298_v58, 16  ;;  %1353 = vmatprep.subr.bf16.mxu1 %v1494_v7 }
  0x65   : > { %1340 = vmatpush3.bf16.msra.mxu0 %v1494_v7  ;;  %v741_v26 = vrot.slane %v739_v15, 1  ;;  %1358 = vmatpush3.bf16.msra.mxu1 %v1494_v7 }
  0x66   : > { %602 = vrot.lane.b32.xlu1 %v587_v18, %s1577_s8  ;;  %v721_v18 = vor.u32 %v720_v4, %v716_v3 }
  0x67   : > { %600 = vrot.lane.b32.xlu0 %v580_v19, %s1577_s8  ;;  %v744_v19 = vshrl.u32 %v1299_v54, 16 }
  0x6a   : > { %630 = vrot.lane.b32.xlu1 %v1279_v23, %s1578_s9  ;;  %v714_v23 = vor.u32 %v713_v13, %v709_v12 }
  0x6b   : > { %628 = vrot.lane.b32.xlu0 %v1278_v25, %s1578_s9  ;;  %v737_v25 = vshrl.u32 %v1298_v58, 16 }
  0x6e   : > { %638 = vrot.lane.b32.xlu1 %v1283_v28, %s1578_s9  ;;  %v749_v28 = vor.u32 %v748_v21, %v744_v19 }
  0x6f   : > { %636 = vrot.lane.b32.xlu0 %v1282_v29, %s1578_s9  ;;  %v730_v29 = vshrl.u32 %v1297_v1, 16 }
  0x72   : > { %634 = vrot.lane.b32.xlu1 %v1281_v32, %s1578_s9  ;;  %v742_v32 = vor.u32 %v741_v26, %v737_v25 }
  0x73   : > { %632 = vrot.lane.b32.xlu0 %v1280_v34, %s1578_s9  ;;  %v723_v34 = vshrl.u32 %v1296_v8, 16 }
  0x75   : > { %v728_v43 = vor.u32 %v727_v35, %v723_v34 }
  0x76   : > { %642 = vrot.lane.b32.xlu1 %v1285_v38, %s1578_s9 }
  0x77   : > { %640 = vrot.lane.b32.xlu0 %v1284_v40, %s1578_s9  ;;  %v735_v40 = vor.u32 %v734_v30, %v730_v29 }
  0x7a   : > { %670 = vrot.lane.b32.xlu1 %v1482_v42, %s1579_s21  ;;  %v762_v42 = vrot.slane %v760_v31, 1 }
  0x7b   : > { %668 = vrot.lane.b32.xlu0 %v1483_v45, %s1579_s21  ;;  %v755_v45 = vrot.slane %v753_v37, 1 }
  0x7d   : > { %v756_v49 = vor.u32 %v755_v45, %v751_v44 }
  0x7e   : > { %678 = vrot.lane.b32.xlu1 %v1484_v48, %s1579_s21  ;;  %v763_v48 = vor.u32 %v762_v42, %v758_v41 }
  0x7f   : > { %676 = vrot.lane.b32.xlu0 %v1485_v52, %s1579_s21 }
  0x82   : > { %674 = vrot.lane.b32.xlu1 %v1486_v55, %s1579_s21 }
  0x83   : > { %672 = vrot.lane.b32.xlu0 %v1487_v60, %s1579_s21 }
  0x86   : > { %682 = vrot.lane.b32.xlu1 %v1488_v2, %s1579_s21 }
  0x87   : > { %680 = vrot.lane.b32.xlu0 %v1489_v10, %s1579_s21 }
  0x8a   : > { %766 = vrot.lane.b32.xlu1 %v721_v18, %s1580_s30 }
  0x8b   : > { %764 = vrot.lane.b32.xlu0 %v714_v23, %s1580_s30 }
  0x8c   : > { %v309_v38 = vpop.permute.xlu1 %308 }
  0x8d   : > { %v301_v39 = vpop.permute.xlu0 %300  ;;  %v795_v62 = vsel %vm780_vm1, %v1690_v14, %v309_v38 }
  0x8e   : > { %774 = vrot.lane.b32.xlu1 %v749_v28, %s1580_s30  ;;  %v783_v56 = vsel %vm780_vm1, %v1680_v9, %v301_v39 }
  0x8f   : > { %772 = vrot.lane.b32.xlu0 %v742_v32, %s1580_s30 }
  0x90   : > { %v311_v46 = vpop.permute.xlu1 %310 }
  0x91   : > { %v303_v47 = vpop.permute.xlu0 %302  ;;  %v798_v60 = vsel %vm780_vm1, %v1684_v11, %v311_v46 }
  0x92   : > { %770 = vrot.lane.b32.xlu1 %v735_v40, %s1580_s30  ;;  %v786_v54 = vsel %vm780_vm1, %v1674_v6, %v303_v47 }
  0x93   : > { %768 = vrot.lane.b32.xlu0 %v728_v43, %s1580_s30 }
  0x94   : > { %v307_v50 = vpop.permute.xlu1 %306 }
  0x95   : > { %v305_v51 = vpop.permute.xlu0 %304  ;;  %v792_v9 = vsel %vm780_vm1, %v1697_v20, %v307_v50 }
  0x96   : > { %778 = vrot.lane.b32.xlu1 %v763_v48, %s1580_s30  ;;  %v789_v2 = vsel %vm780_vm1, %v1701_v24, %v305_v51 }
  0x97   : > { %776 = vrot.lane.b32.xlu0 %v756_v49, %s1580_s30 }
  0x98   : > { %v315_v52 = vpop.permute.xlu1 %314 }
  0x99   : > { %v313_v53 = vpop.permute.xlu0 %312  ;;  %v804_v14 = vsel %vm780_vm1, %v1709_v33, %v315_v52 }
  0x9a   : > { %v801_v7 = vsel %vm780_vm1, %v1714_v36, %v313_v53 }
  0x9c   : > { %v415_v55 = vpop.permute.xlu1 %414 }
  0x9d   : > { %v809_v57 = vsel %vm805_vm2, %v786_v54, %v415_v55  ;;  %v413_v58 = vpop.permute.xlu0 %412 }
  0x9e   : > { %v807_v59 = vsel %vm805_vm2, %v783_v56, %v413_v58 }
  0xa0   : > { %v423_v61 = vpop.permute.xlu1 %422 }
  0xa1   : > { %v817_v63 = vsel %vm805_vm2, %v798_v60, %v423_v61  ;;  %v421_v0 = vpop.permute.xlu0 %420 }
  0xa2   : > { %v815_v6 = vsel %vm805_vm2, %v795_v62, %v421_v0 }
  0xa4   : > { %v419_v1 = vpop.permute.xlu1 %418 }
  0xa5   : > { %v813_v3 = vsel %vm805_vm2, %v792_v9, %v419_v1  ;;  %v417_v4 = vpop.permute.xlu0 %416 }
  0xa6   : > { %v811_v11 = vsel %vm805_vm2, %v789_v2, %v417_v4 }
  0xa8   : > { %v427_v5 = vpop.permute.xlu1 %426 }
  0xa9   : > { %v821_v8 = vsel %vm805_vm2, %v804_v14, %v427_v5  ;;  %v425_v10 = vpop.permute.xlu0 %424 }
  0xaa   : > { %v819_v20 = vsel %vm805_vm2, %v801_v7, %v425_v10 }
  0xac   : > { %v455_v12 = vpop.permute.xlu1 %454 }
  0xad   : > { %v826_v24 = vsel %vm822_vm3, %v809_v57, %v455_v12  ;;  %v453_v13 = vpop.permute.xlu0 %452 }
  0xae   : > { %v824_v15 = vsel %vm822_vm3, %v807_v59, %v453_v13 }
  0xb0   : > { %v463_v16 = vpop.permute.xlu1 %462 }
  0xb1   : > { %v834_v17 = vsel %vm822_vm3, %v817_v63, %v463_v16  ;;  %v461_v33 = vpop.permute.xlu0 %460 }
  0xb2   : > { %v832_v18 = vsel %vm822_vm3, %v815_v6, %v461_v33 }
  0xb4   : > { %v459_v19 = vpop.permute.xlu1 %458 }
  0xb5   : > { %v1844_v36 = vsel %vm822_vm3, %v813_v3, %v459_v19  ;;  %v457_v21 = vpop.permute.xlu0 %456 }
  0xb6   : > { %v1847_v22 = vsel %vm822_vm3, %v811_v11, %v457_v21 }
  0xb8   : > { %v467_v23 = vpop.permute.xlu1 %466 }
  0xb9   : > { %v1850_v25 = vsel %vm822_vm3, %v821_v8, %v467_v23  ;;  %v465_v26 = vpop.permute.xlu0 %464 }
  0xba   : > { %v1853_v27 = vsel %vm822_vm3, %v819_v20, %v465_v26 }
  0xbc   : > { %v495_v28 = vpop.permute.xlu1 %494 }
  0xbd   : > { %v493_v29 = vpop.permute.xlu0 %492  ;;  %v843_v61 = vsel %vm839_vm4, %v826_v24, %v495_v28 }
  0xbe   : > { %v841_v63 = vsel %vm839_vm4, %v824_v15, %v493_v29 }
  0xc0   : > { %v503_v30 = vpop.permute.xlu1 %502 }
  0xc1   : > { %v501_v31 = vpop.permute.xlu0 %500  ;;  %v851_v4 = vsel %vm839_vm4, %v834_v17, %v503_v30 }
  0xc2   : > { %v849_v7 = vsel %vm839_vm4, %v832_v18, %v501_v31 }
  0xc4   : > { %v499_v32 = vpop.permute.xlu1 %498 }
  0xc5   : > { %v497_v34 = vpop.permute.xlu0 %496  ;;  %v847_v17 = vsel %vm839_vm4, %v1844_v36, %v499_v32 }
  0xc6   : > { %v845_v21 = vsel %vm839_vm4, %v1847_v22, %v497_v34 }
  0xc8   : > { %v1855_v35 = vpop.permute.xlu1 %506 }
  0xc9   : > { %v1857_v37 = vpop.permute.xlu0 %504 }
  0xcc   : > { %v591_v38 = vpop.permute.xlu1 %590 }
  0xcd   : > { %v589_v39 = vpop.permute.xlu0 %588  ;;  %v860_v0 = vsel %vm856_vm5, %v843_v61, %v591_v38  ;;  %v855_v38 = vsel %vm839_vm4, %v1850_v25, %v1855_v35 }
  0xce   : > { %v858_v6 = vsel %vm856_vm5, %v841_v63, %v589_v39 }
  0xd0   : > { %v599_v40 = vpop.permute.xlu1 %598 }
  0xd1   : > { %v597_v41 = vpop.permute.xlu0 %596  ;;  %v868_v8 = vsel %vm856_vm5, %v851_v4, %v599_v40  ;;  %v853_v40 = vsel %vm839_vm4, %v1853_v27, %v1857_v37 }
  0xd2   : > { %v866_v20 = vsel %vm856_vm5, %v849_v7, %v597_v41 }
  0xd4   : > { %v595_v42 = vpop.permute.xlu1 %594 }
  0xd5   : > { %v593_v43 = vpop.permute.xlu0 %592  ;;  %v864_v23 = vsel %vm856_vm5, %v847_v17, %v595_v42 }
  0xd6   : > { %v862_v28 = vsel %vm856_vm5, %v845_v21, %v593_v43 }
  0xd8   : > { %v1859_v44 = vpop.permute.xlu1 %602 }
  0xd9   : > { %v1861_v45 = vpop.permute.xlu0 %600  ;;  %v872_v41 = vsel %vm856_vm5, %v855_v38, %v1859_v44 }
  0xda   : > { %v870_v25 = vsel %vm856_vm5, %v853_v40, %v1861_v45  ;;  %v1302_v45 = vld [vmem:[%s1979_s2] ss:$0 sm:$0xff] }
  0xdc   : > { %v631_v46 = vpop.permute.xlu1 %630 }
  0xdd   : > { %v629_v47 = vpop.permute.xlu0 %628  ;;  %v877_v9 = vsel %vm873_vm6, %v860_v0, %v631_v46 }
  0xde   : > { %v875_v1 = vsel %vm873_vm6, %v858_v6, %v629_v47 }
  0xe0   : > { %v639_v48 = vpop.permute.xlu1 %638 }
  0xe1   : > { %v637_v49 = vpop.permute.xlu0 %636  ;;  %v885_v12 = vsel %vm873_vm6, %v868_v8, %v639_v48 }
  0xe2   : > { %v883_v13 = vsel %vm873_vm6, %v866_v20, %v637_v49 }
  0xe4   : > { %v635_v50 = vpop.permute.xlu1 %634 }
  0xe5   : > { %v633_v51 = vpop.permute.xlu0 %632  ;;  %v881_v29 = vsel %vm873_vm6, %v864_v23, %v635_v50 }
  0xe6   : > { %v879_v36 = vsel %vm873_vm6, %v862_v28, %v633_v51 }
  0xe8   : > { %v643_v52 = vpop.permute.xlu1 %642 }
  0xe9   : > { %v641_v53 = vpop.permute.xlu0 %640  ;;  %v889_v35 = vsel %vm873_vm6, %v872_v41, %v643_v52 }
  0xea   : > { %v887_v46 = vsel %vm873_vm6, %v870_v25, %v641_v53 }
  0xec   : > { %v671_v54 = vpop.permute.xlu1 %670 }
  0xed   : > { %v669_v55 = vpop.permute.xlu0 %668  ;;  %v894_v2 = vsel %vm890_vm7, %v877_v9, %v671_v54 }
  0xee   : > { %v892_v11 = vsel %vm890_vm7, %v875_v1, %v669_v55 }
  0xf0   : > { %v679_v56 = vpop.permute.xlu1 %678 }
  0xf1   : > { %v677_v57 = vpop.permute.xlu0 %676  ;;  %v902_v15 = vsel %vm890_vm7, %v885_v12, %v679_v56 }
  0xf2   : > { %v900_v33 = vsel %vm890_vm7, %v883_v13, %v677_v57 }
  0xf4   : > { %v675_v58 = vpop.permute.xlu1 %674 }
  0xf5   : > { %v673_v59 = vpop.permute.xlu0 %672  ;;  %v898_v31 = vsel %vm890_vm7, %v881_v29, %v675_v58 }
  0xf6   : > { %v896_v22 = vsel %vm890_vm7, %v879_v36, %v673_v59 }
  0xf8   : > { %v683_v60 = vpop.permute.xlu1 %682 }
  0xf9   : > { %v681_v62 = vpop.permute.xlu0 %680  ;;  %v906_v47 = vsel %vm890_vm7, %v889_v35, %v683_v60 }
  0xfa   : > { %v904_v27 = vsel %vm890_vm7, %v887_v46, %v681_v62 }
  0xfc   : > { %v767_v3 = vpop.permute.xlu1 %766 }
  0xfd   : > { %v911_v14 = vsel %vm907_vm8, %v894_v2, %v767_v3  ;;  %v765_v5 = vpop.permute.xlu0 %764 }
  0xfe   : > { %v909_v10 = vsel %vm907_vm8, %v892_v11, %v765_v5 }
  0xff   : > { %v1303_v24 = vcombine.low %v909_v10, %v911_v14 }
 0x100   : > { %v775_v16 = vpop.permute.xlu1 %774 }
 0x101   : > { %v919_v18 = vsel %vm907_vm8, %v902_v15, %v775_v16  ;;  %1341 = vmatprep.mubr.msk.bf16.mxu0 %vm987_vm9, %v1303_v24  ;;  %v773_v19 = vpop.permute.xlu0 %772 }
 0x102   : > { %v917_v26 = vsel %vm907_vm8, %v900_v33, %v773_v19 }
 0x103   : > { %v1305_v30 = vcombine.low %v917_v26, %v919_v18 }
 0x104   : > { %v771_v32 = vpop.permute.xlu1 %770 }
 0x105   : > { %v915_v34 = vsel %vm907_vm8, %v898_v31, %v771_v32  ;;  %1345 = vmatprep.mubr.msk.bf16.mxu1 %vm987_vm9, %v1305_v30  ;;  %v769_v39 = vpop.permute.xlu0 %768 }
 0x106   : > { %v913_v42 = vsel %vm907_vm8, %v896_v22, %v769_v39 }
 0x107   : > { %v1304_v43 = vcombine.low %v913_v42, %v915_v34 }
 0x108   : > { %v779_v48 = vpop.permute.xlu1 %778 }
 0x109   : > { %v923_v37 = vsel %vm907_vm8, %v906_v47, %v779_v48  ;;  %1342 = vmatmul.mubr.msk.bf16.vlgmr.msra.gmra.mxu0 %vm987_vm9, %v1304_v43  ;;  %v777_v44 = vpop.permute.xlu0 %776 }
 0x10a   : > { %v921_v49 = vsel %vm907_vm8, %v904_v27, %v777_v44 }
 0x10b   : > { %v1306_v50 = vcombine.low %v921_v49, %v923_v37 }
 0x10d   : > { %1346 = vmatmul.mubr.msk.bf16.vlgmr.msra.gmra.mxu1 %vm987_vm9, %v1306_v50 }
 0x1c9   : > { %v1343_v51 = vpop.f32.mrf.mxu0 }
 0x1ca   : > { %v1047_v52 = vadd.f32 %v1343_v51, %v1302_v45 }
 0x1cb   : > { %v1038_v53 = vpop.f32.mrf.mxu0 }
 0x1cc   : > { %1071 = vst [vmem:[%s187_s10 + $0x10] sm:$0xff] %v1047_v52  ;;  %v1039_v54 = vadd.f32 %v1302_v45, %v1038_v53 }
 0x1cd   : > { %v1344_v55 = vpop.f32.mrf.mxu0  ;;  %v1347_v56 = vpop.f32.mrf.mxu1 }
 0x1ce   : > { %1069 = vst [vmem:[%s187_s10] sm:$0xff] %v1039_v54  ;;  %v1050_v57 = vadd.f32 %v1344_v55, %v1302_v45  ;;  %v1063_v58 = vadd.f32 %v1347_v56, %v1302_v45 }
 0x1cf   : > { %v1041_v59 = vpop.f32.mrf.mxu0  ;;  %v1054_v60 = vpop.f32.mrf.mxu1 }
 0x1d0   : > { %1072 = vst [vmem:[%s187_s10 + $0x18] sm:$0xff] %v1050_v57  ;;  %1075 = vst [vmem:[%s187_s10 + $0x30] sm:$0xff] %v1063_v58  ;;  %v1042_v61 = vadd.f32 %v1302_v45, %v1041_v59  ;;  %v1055_v62 = vadd.f32 %v1302_v45, %v1054_v60 }
 0x1d1   : > { %v1348_v63 = vpop.f32.mrf.mxu1 }
 0x1d2   : > { %1070 = vst [vmem:[%s187_s10 + $0x8] sm:$0xff] %v1042_v61  ;;  %1073 = vst [vmem:[%s187_s10 + $0x20] sm:$0xff] %v1055_v62  ;;  %v1066_v0 = vadd.f32 %v1348_v63, %v1302_v45 }
 0x1d3   : > { %v1057_v6 = vpop.f32.mrf.mxu1 }
 0x1d4   : > { %1076 = vst [vmem:[%s187_s10 + $0x38] sm:$0xff] %v1066_v0  ;;  %v1058_v9 = vadd.f32 %v1302_v45, %v1057_v6 }
 0x1d6   : > { %1074 = vst [vmem:[%s187_s10 + $0x28] sm:$0xff] %v1058_v9 }
 0x1d7   : > { %1508 = shalt.err (!%p1505_p5)
}
 0x1d8   : > { %s1509_s5 = scalar_lea.hbm %s1925_s23, 1024  ;;  %s1513_s7 = scalar_lea.hbm %s1980_s3, 2048 }
 0x1d9   : > { %p1510_p6 = scmp.ne.s32.totalorder %s1925_s23, %s1509_s5  ;;  %p1514_p10 = scmp.lt.s32.totalorder %s1925_s23, %s1980_s3 }
 0x1da   : > { %p1515_p11 = scmp.lt.s32.totalorder %s1513_s7, %s1509_s5 }
 0x1db   : > { %p1511_p7 = pnand %p1510_p6, %p1643_p4 }
 0x1dc   : > { %p1516_p12 = por %p1515_p11, %p1514_p10 }
 0x1dd   : > { %p1512_p9 = pneg %p1511_p7 }
 0x1df   : > { %p1517_p13 = pnand %p1516_p12, %p1512_p9 }
 0x1e1   : > { %1520 = shalt.err (!%p1517_p13)
}
 0x1e2   : > { %s1582_s10 = smov 128  }
 0x1e3   : > { %1362 = dma.vmem_to_hbm [thread:$0]  (%p1643_p4), %s1927_s18, 1024, %s1925_s23, %s1931_s15, %s1582_s10, %s1582_s10, %s1573_s4  }
 0x1e4 PF: > { %p1368_p0 = scmp.ge.s32.totalorder %s1571_s17, 2  ;;  %s1108_s11 = sand.u32 1, %s1551_s12  }
 0x1e5   : > { %s1109_s19 = scalar_lea.sflag [#allocation3], %s1108_s11 }
 0x1e6   : > { %p1365_p1 = pnand %p1368_p0, %p1650_p8 }
 0x1e8   : > { %p1366_p2 = pneg %p1365_p1 }
 0x1ea   : > { %1546 = dma.done.wait (%p1366_p2), %s1109_s19, 1024  }
 0x1eb   : > { %1548 = vsyncadd (%p1366_p2), %s1109_s19, 4294966272  ;;  %s16_s17 = sadd.s32 1, %s1571_s17   ;;  %s1983_s12 = smov %s1555_s13 }
 0x1ec   : > { %p13_p3 = scmp.ge.s32.totalorder %s16_s17, 4   ;;  %s1984_s13 = smov %s1559_s14 }
 0x1ed   : > { %s1985_s14 = smov %s1656_s25  ;;  %s1986_s15 = smov %s1567_s16 }
 0x1ee   : > { %s1987_s16 = smov %s1989_s20  ;;  %15 = sbr.rel (!%p13_p3) target bundleno = 4 (0x4), region = 72 }
 0x1f3   :  { %1114 = vsyncpa [#allocation3], 1 }
 0x1f4   :  { %1116 = vsyncpa [#allocation3 + $0x1], 1 }

</bundles_post_ra>
